<compile_context>
chip_gen: v7x
topology: tpu7x:2x2x1
jax: 0.10.0
libtpu: 0.0.40
codegen_flags: <defaults>
</compile_context>

<pallas_src>
import functools

import jax
import jax.numpy as jnp
from jax.experimental import pallas as pl
from jax.experimental.pallas import tpu as pltpu


def _round_up(v, m):
    return ((v + m - 1) // m) * m


def diet_kernel(xt_t_ref, x_t_ref,
                w_er1_ref, b_er1_ref,     # (2E, SP) bf16 , (2E, 1) f32
                w_er2_ref, b_er2_ref,     # (2H, 2E) bf16 block-diag, (2H, 1) f32
                w_l2_ref, b_l2_ref,       # (H, OP) bf16 , (1, OP) f32
                y_ref, xhat_ref,
                *, hidden_p):
    f32 = jnp.float32
    bf16 = jnp.bfloat16

    xt_t = xt_t_ref[...]                     # (SP, IP)  bf16  == padded x_t^T
    x_t = x_t_ref[...]                       # (IP, BP)  bf16  == padded x^T

    # ---- fused first aux layer (embedding || reconstruction), transposed ----
    # (2E, SP) @ (SP, IP) -> (2E, IP): K = sample_size pushed once, lanes = IP.
    er1 = (jnp.dot(w_er1_ref[...], xt_t, preferred_element_type=f32)
           + b_er1_ref[...])
    act1 = jnp.maximum(er1, 0.0).astype(bf16)     # dropout == identity (eval mode)

    # ---- fused second aux layer (block-diagonal) -> [We^T ; Wr^T] ----
    # (2H, 2E) @ (2E, IP) -> (2H, IP)
    wer_t = (jnp.dot(w_er2_ref[...], act1, preferred_element_type=f32)
             + b_er2_ref[...])
    we_t = wer_t[:hidden_p, :].astype(bf16)       # We^T : (H, IP)
    wr_t = wer_t[hidden_p:, :].astype(bf16)       # Wr^T : (H, IP)  (used directly)

    # ---- h^T = relu(We^T @ x^T) : (H, IP) @ (IP, BP) -> (H, BP) ----
    h_t = jnp.maximum(jnp.dot(we_t, x_t, preferred_element_type=f32), 0.0)
    # Only transpose in the kernel: tiny (H, BP) -> (BP, H), so the two output
    # matmuls below are plain A @ B with lane-dense results.
    h = jnp.transpose(h_t).astype(bf16)           # (BP, H)

    # ---- y = l2(h) : (BP, H) @ (H, OP) + b ----
    y_ref[...] = (jnp.dot(h, w_l2_ref[...], preferred_element_type=f32)
                  + b_l2_ref[...])

    # ---- x_hat = sigmoid(h @ Wr^T) : (BP, H) @ (H, IP) ----
    logits = jnp.dot(h, wr_t, preferred_element_type=f32)
    xhat_ref[...] = jax.nn.sigmoid(logits)


@jax.jit
def diet_networks_forward(x, x_t, params):
    """DietNetworks forward (eval mode, use_reconstruction=True).

    params follow PyTorch nn.Linear conventions: W_* is (out_features, in_features).
    Returns (y, x_hat) matching the PyTorch module.
    """
    x = jnp.asarray(x, jnp.float32)
    x_t = jnp.asarray(x_t, jnp.float32)
    batch, input_size = x.shape
    sample_size = x_t.shape[1]
    emb = params["W_e1"].shape[0]
    hidden = params["W_e2"].shape[0]
    out_size = params["W_l2"].shape[0]

    # Padded TPU-friendly sizes: lane dims -> multiples of 128, sublane dims -> 8.
    BP = _round_up(batch, 8)
    IP = _round_up(input_size, 128)
    SP = _round_up(sample_size, 128)
    OP = _round_up(out_size, 128)
    HP = _round_up(hidden, 8)
    EP = _round_up(emb, 8)

    f32, bf16 = jnp.float32, jnp.bfloat16

    def pad2(a, r, c):
        a = jnp.asarray(a, f32)
        return jnp.pad(a, ((0, r - a.shape[0]), (0, c - a.shape[1])))

    def pad1(a, n):
        a = jnp.asarray(a, f32)
        return jnp.pad(a, (0, n - a.shape[0]))

    # Data: transposed + zero-padded in XLA so the kernel never transposes anything big.
    xt_t = pad2(x_t, IP, SP).T.astype(bf16)          # (SP, IP)
    x_tT = pad2(x, BP, IP).T.astype(bf16)            # (IP, BP)

    # Fused first-layer weight: rows = [W_e1 ; W_r1]  -> (2EP, SP).
    w_er1 = jnp.concatenate([pad2(params["W_e1"], EP, SP),
                             pad2(params["W_r1"], EP, SP)], axis=0).astype(bf16)
    b_er1 = jnp.concatenate([pad1(params["b_e1"], EP),
                             pad1(params["b_r1"], EP)]).reshape(2 * EP, 1)

    # Fused second-layer weight: block-diag(W_e2, W_r2) -> (2HP, 2EP).
    w_er2 = jnp.zeros((2 * HP, 2 * EP), f32)
    w_er2 = w_er2.at[:HP, :EP].set(pad2(params["W_e2"], HP, EP))
    w_er2 = w_er2.at[HP:, EP:].set(pad2(params["W_r2"], HP, EP))
    w_er2 = w_er2.astype(bf16)
    b_er2 = jnp.concatenate([pad1(params["b_e2"], HP),
                             pad1(params["b_r2"], HP)]).reshape(2 * HP, 1)

    # Classifier weight pre-transposed and zero-padded to a full 128-lane slab.
    w_l2 = pad2(params["W_l2"], OP, HP).T.astype(bf16)   # (HP, OP)
    b_l2 = pad1(params["b_l2"], OP).reshape(1, OP)

    vmem = pl.BlockSpec(memory_space=pltpu.MemorySpace.VMEM)
    kernel = functools.partial(diet_kernel, hidden_p=HP)

    y_p, xhat_p = pl.pallas_call(
        kernel,
        out_shape=(jax.ShapeDtypeStruct((BP, OP), f32),
                   jax.ShapeDtypeStruct((BP, IP), f32)),
        in_specs=[vmem] * 8,
        out_specs=(vmem, vmem),
        # Explicit VMEM limit so the same config also fits v5e's smaller default
        # scoped-VMEM; everything here is far below it at these sizes.
        compiler_params=pltpu.CompilerParams(vmem_limit_bytes=64 << 20),
    )(xt_t, x_tT, w_er1, b_er1, w_er2, b_er2, w_l2, b_l2)

    # Strip zero-padding.
    return y_p[:batch, :out_size], xhat_p[:batch, :input_size]


def _reference_forward(x, x_t, p):
    """Plain-JAX (f32) reference replicating the PyTorch forward in eval mode."""
    def lin(v, W, b):
        return v @ W.T + b
    We = lin(jax.nn.relu(lin(x_t, p["W_e1"], p["b_e1"])), p["W_e2"], p["b_e2"])
    h = jax.nn.relu(x @ We)
    y = lin(h, p["W_l2"], p["b_l2"])
    Wr = lin(jax.nn.relu(lin(x_t, p["W_r1"], p["b_r1"])), p["W_r2"], p["b_r2"])
    x_hat = jax.nn.sigmoid(h @ Wr.T)
    return y, x_hat


if __name__ == "__main__":
    # Small, deliberately non-aligned module hyperparameters (exercise padding).
    input_size = 100
    hidden_size = 64
    output_size = 10
    sample_size = 120
    embedding_size = 32
    batch = 6

    key = jax.random.PRNGKey(0)
    ks = jax.random.split(key, 12)

    def init_w(k, out_f, in_f):
        return jax.random.normal(k, (out_f, in_f), jnp.float32) / jnp.sqrt(in_f)

    params = {
        "W_e1": init_w(ks[0], embedding_size, sample_size),
        "b_e1": 0.01 * jax.random.normal(ks[1], (embedding_size,), jnp.float32),
        "W_e2": init_w(ks[2], hidden_size, embedding_size),
        "b_e2": 0.01 * jax.random.normal(ks[3], (hidden_size,), jnp.float32),
        "W_l2": init_w(ks[4], output_size, hidden_size),
        "b_l2": 0.01 * jax.random.normal(ks[5], (output_size,), jnp.float32),
        "W_r1": init_w(ks[6], embedding_size, sample_size),
        "b_r1": 0.01 * jax.random.normal(ks[7], (embedding_size,), jnp.float32),
        "W_r2": init_w(ks[8], hidden_size, embedding_size),
        "b_r2": 0.01 * jax.random.normal(ks[9], (hidden_size,), jnp.float32),
    }

    x = 0.25 * jax.random.normal(ks[10], (batch, input_size), jnp.float32)
    x_t = jax.random.normal(ks[11], (input_size, sample_size), jnp.float32)

    y, x_hat = diet_networks_forward(x, x_t, params)
    jax.block_until_ready((y, x_hat))

    y_ref, x_hat_ref = _reference_forward(x, x_t, params)
    assert y.shape == (batch, output_size)
    assert x_hat.shape == (batch, input_size)
    # bf16 MXU operands with f32 accumulation -> ~1e-2-level agreement vs f32 ref.
    assert jnp.allclose(y, y_ref, rtol=5e-2, atol=5e-2), \
        float(jnp.max(jnp.abs(y - y_ref)))
    assert jnp.allclose(x_hat, x_hat_ref, atol=5e-2), \
        float(jnp.max(jnp.abs(x_hat - x_hat_ref)))

    print("KERNEL_OK")
</pallas_src>

<mosaic_0001>
module attributes {stable_mosaic.version = 11 : i64} {
  func.func @diet_kernel(%arg0: memref<128x128xbf16, #tpu.memory_space<vmem>>, %arg1: memref<128x8xbf16, #tpu.memory_space<vmem>>, %arg2: memref<64x128xbf16, #tpu.memory_space<vmem>>, %arg3: memref<64x1xf32, #tpu.memory_space<vmem>>, %arg4: memref<128x64xbf16, #tpu.memory_space<vmem>>, %arg5: memref<128x1xf32, #tpu.memory_space<vmem>>, %arg6: memref<64x128xbf16, #tpu.memory_space<vmem>>, %arg7: memref<1x128xf32, #tpu.memory_space<vmem>>, %arg8: memref<8x128xf32, #tpu.memory_space<vmem>>, %arg9: memref<8x128xf32, #tpu.memory_space<vmem>>) attributes {dimension_semantics = [], scalar_prefetch = 0 : i64, scratch_operands = 0 : i64, tpu.core_type = #tpu.core_type<tc>} {
    %c0 = arith.constant 0 : index
    %c0_0 = arith.constant 0 : index
    %0 = vector.load %arg0[%c0, %c0_0] : memref<128x128xbf16, #tpu.memory_space<vmem>>, vector<128x128xbf16>
    %c0_1 = arith.constant 0 : index
    %c0_2 = arith.constant 0 : index
    %1 = vector.load %arg1[%c0_1, %c0_2] : memref<128x8xbf16, #tpu.memory_space<vmem>>, vector<128x8xbf16>
    %c0_3 = arith.constant 0 : index
    %c0_4 = arith.constant 0 : index
    %2 = vector.load %arg2[%c0_3, %c0_4] : memref<64x128xbf16, #tpu.memory_space<vmem>>, vector<64x128xbf16>
    %cst = arith.constant dense<0.000000e+00> : vector<64x128xf32>
    %3 = tpu.matmul %2, %0, %cst {dimension_numbers = #tpu.dot_dimension_numbers<[1], [0], [0], [1], [0, 0, 1, 1], [], []>} : vector<64x128xbf16>, vector<128x128xbf16>, vector<64x128xf32> -> vector<64x128xf32>
    %c0_5 = arith.constant 0 : index
    %c0_6 = arith.constant 0 : index
    %4 = vector.load %arg3[%c0_5, %c0_6] : memref<64x1xf32, #tpu.memory_space<vmem>>, vector<64x1xf32>
    %5 = vector.broadcast %4 : vector<64x1xf32> to vector<64x128xf32>
    %6 = arith.addf %3, %5 : vector<64x128xf32>
    %cst_7 = arith.constant 0.000000e+00 : f32
    %7 = vector.broadcast %cst_7 : f32 to vector<64x128xf32>
    %8 = arith.maximumf %6, %7 : vector<64x128xf32>
    %9 = arith.truncf %8 : vector<64x128xf32> to vector<64x128xbf16>
    %c0_8 = arith.constant 0 : index
    %c0_9 = arith.constant 0 : index
    %10 = vector.load %arg4[%c0_8, %c0_9] : memref<128x64xbf16, #tpu.memory_space<vmem>>, vector<128x64xbf16>
    %cst_10 = arith.constant dense<0.000000e+00> : vector<128x128xf32>
    %11 = tpu.matmul %10, %9, %cst_10 {dimension_numbers = #tpu.dot_dimension_numbers<[1], [0], [0], [1], [0, 0, 1, 1], [], []>} : vector<128x64xbf16>, vector<64x128xbf16>, vector<128x128xf32> -> vector<128x128xf32>
    %c0_11 = arith.constant 0 : index
    %c0_12 = arith.constant 0 : index
    %12 = vector.load %arg5[%c0_11, %c0_12] : memref<128x1xf32, #tpu.memory_space<vmem>>, vector<128x1xf32>
    %13 = vector.broadcast %12 : vector<128x1xf32> to vector<128x128xf32>
    %14 = arith.addf %11, %13 : vector<128x128xf32>
    %15 = vector.extract_strided_slice %14 {offsets = [0, 0], sizes = [64, 128], strides = [1, 1]} : vector<128x128xf32> to vector<64x128xf32>
    %16 = arith.truncf %15 : vector<64x128xf32> to vector<64x128xbf16>
    %17 = vector.extract_strided_slice %14 {offsets = [64, 0], sizes = [64, 128], strides = [1, 1]} : vector<128x128xf32> to vector<64x128xf32>
    %18 = arith.truncf %17 : vector<64x128xf32> to vector<64x128xbf16>
    %cst_13 = arith.constant dense<0.000000e+00> : vector<64x8xf32>
    %19 = tpu.matmul %16, %1, %cst_13 {dimension_numbers = #tpu.dot_dimension_numbers<[1], [0], [0], [1], [0, 0, 1, 1], [], []>} : vector<64x128xbf16>, vector<128x8xbf16>, vector<64x8xf32> -> vector<64x8xf32>
    %cst_14 = arith.constant 0.000000e+00 : f32
    %20 = vector.broadcast %cst_14 : f32 to vector<64x8xf32>
    %21 = arith.maximumf %19, %20 : vector<64x8xf32>
    %22 = tpu.transpose %21, [1, 0] : vector<64x8xf32> -> vector<8x64xf32>
    %23 = arith.truncf %22 : vector<8x64xf32> to vector<8x64xbf16>
    %c0_15 = arith.constant 0 : index
    %c0_16 = arith.constant 0 : index
    %24 = vector.load %arg6[%c0_15, %c0_16] : memref<64x128xbf16, #tpu.memory_space<vmem>>, vector<64x128xbf16>
    %cst_17 = arith.constant dense<0.000000e+00> : vector<8x128xf32>
    %25 = tpu.matmul %23, %24, %cst_17 {dimension_numbers = #tpu.dot_dimension_numbers<[1], [0], [0], [1], [0, 0, 1, 1], [], []>} : vector<8x64xbf16>, vector<64x128xbf16>, vector<8x128xf32> -> vector<8x128xf32>
    %c0_18 = arith.constant 0 : index
    %c0_19 = arith.constant 0 : index
    %26 = vector.load %arg7[%c0_18, %c0_19] : memref<1x128xf32, #tpu.memory_space<vmem>>, vector<1x128xf32>
    %27 = vector.broadcast %26 : vector<1x128xf32> to vector<8x128xf32>
    %28 = arith.addf %25, %27 : vector<8x128xf32>
    %c0_20 = arith.constant 0 : index
    %c0_21 = arith.constant 0 : index
    %29 = vector.load %arg8[%c0_20, %c0_21] : memref<8x128xf32, #tpu.memory_space<vmem>>, vector<8x128xf32>
    tpu.vector_store %arg8[%c0_20, %c0_21], %28 {strides = array<i32>} : memref<8x128xf32, #tpu.memory_space<vmem>>, vector<8x128xf32>,
    %cst_22 = arith.constant dense<0.000000e+00> : vector<8x128xf32>
    %30 = tpu.matmul %23, %18, %cst_22 {dimension_numbers = #tpu.dot_dimension_numbers<[1], [0], [0], [1], [0, 0, 1, 1], [], []>} : vector<8x64xbf16>, vector<64x128xbf16>, vector<8x128xf32> -> vector<8x128xf32>
    %31 = arith.negf %30 : vector<8x128xf32>
    %32 = math.exp %31 : vector<8x128xf32>
    %cst_23 = arith.constant 1.000000e+00 : f32
    %33 = vector.broadcast %cst_23 : f32 to vector<8x128xf32>
    %34 = arith.addf %33, %32 : vector<8x128xf32>
    %35 = arith.divf %33, %34 : vector<8x128xf32>
    %c0_24 = arith.constant 0 : index
    %c0_25 = arith.constant 0 : index
    %36 = vector.load %arg9[%c0_24, %c0_25] : memref<8x128xf32, #tpu.memory_space<vmem>>, vector<8x128xf32>
    tpu.vector_store %arg9[%c0_24, %c0_25], %35 {strides = array<i32>} : memref<8x128xf32, #tpu.memory_space<vmem>>, vector<8x128xf32>,
    return
  }
}

</mosaic_0001>

<bundles_post_ra>
// kernel: diet_networks_forward.1
= control target key start
LH: loop header
LB: loop body
LE: loop exit
PB: predicated region body
PF: predicated region fallthrough
CT: control target
= control target key end

     0   :  { %15 = vsyncpa [#allocation3], 0  ;;  %s1693_s0 = inlined_call_operand.hbm [shape: bf16[128,128], index: 0, kind: input, shape index: {}]   ;;  %s1694_s1 = inlined_call_operand.hbm [shape: bf16[128,8], index: 1, kind: input, shape index: {}]   ;;  %s1695_s2 = inlined_call_operand.hbm [shape: bf16[64,128], index: 2, kind: input, shape index: {}]   ;;  %s1696_s3 = inlined_call_operand.hbm [shape: f32[64,1], index: 3, kind: input, shape index: {}]   ;;  %s1697_s4 = inlined_call_operand.hbm [shape: bf16[128,64], index: 4, kind: input, shape index: {}]   ;;  %s1698_s5 = inlined_call_operand.hbm [shape: f32[128,1], index: 5, kind: input, shape index: {}]   ;;  %s1699_s6 = inlined_call_operand.hbm [shape: bf16[64,128], index: 6, kind: input, shape index: {}]   ;;  %s1700_s7 = inlined_call_operand.hbm [shape: f32[1,128], index: 7, kind: input, shape index: {}]   ;;  %s1701_s8 = inlined_call_operand.hbm [shape: f32[8,128], index: 8, kind: output, shape index: {0}]   ;;  %s1702_s9 = inlined_call_operand.hbm [shape: f32[8,128], index: 9, kind: output, shape index: {1}]  }
   0x1   :  { %16 = vsyncpa [#allocation6], 0 }
   0x2   :  { %17 = vsyncpa [#allocation9], 0 }
   0x3   :  { %18 = vsyncpa [#allocation12], 0 }
   0x4   :  { %19 = vsyncpa [#allocation15], 0 }
   0x5   :  { %20 = vsyncpa [#allocation4], 0 }
   0x6   :  { %21 = vsyncpa [#allocation18], 0  ;;  %s1452_s30 = smov [#allocation5]   ;;  %s1453_s11 = smov [#allocation8]  }
   0x7   :  { %s39_s10 = sshll.u32 %s1452_s30, 4  ;;  %s63_s12 = sshll.u32 %s1453_s11, 4  ;;  %s40_s10 = int_to_ptr.vmem [resolvable:$true] %s39_s10  ;;  %s1519_s12 = int_to_ptr.vmem [resolvable:$true] %s63_s12 }
   0x8   :  { %s1218_s15 = scalar_lea.hbm %s1694_s1, 1024 }
   0x9   :  { %p1219_p0 = scmp.ne.s32.totalorder %s1694_s1, %s1218_s15  ;;  %p1222_p1 = scmp.lt.u32.totalorder %s1218_s15, %s1694_s1 }
   0xb   :  { %p1224_p2 = pnand %p1222_p1, %p1219_p0 }
   0xd   :  { %1227 = shalt.err (!%p1224_p2)
}
   0xe   :  { %s1228_s20 = scalar_lea.vmem %s40_s10, 1024  ;;  %p1233_p4 = scmp.lt.s32.totalorder %s40_s10, %s40_s10 }
   0xf   :  { %p1229_p3 = scmp.ne.s32.totalorder %s40_s10, %s1228_s20  ;;  %p1234_p5 = scmp.lt.s32.totalorder %s1228_s20, %s1228_s20 }
  0x11   :  { %p1235_p6 = por %p1234_p5, %p1233_p4 }
  0x13   :  { %p1236_p7 = pnand %p1235_p6, %p1229_p3 }
  0x15   :  { %1239 = shalt.err (!%p1236_p7)
}
  0x16   :  { %s1454_s21 = smov 64   ;;  %s1455_s22 = smov 4  }
  0x17   :  { %45 = dma.hbm_to_vmem [thread:$0]  %s1694_s1, 1024, %s40_s10, [#allocation6], %s1454_s21, %s1454_s21, %s1455_s22  }
  0x18   :  { %s1240_s27 = scalar_lea.hbm %s1696_s3, 1024 }
  0x19   :  { %p1241_p8 = scmp.ne.s32.totalorder %s1696_s3, %s1240_s27  ;;  %p1244_p9 = scmp.lt.u32.totalorder %s1240_s27, %s1696_s3 }
  0x1b   :  { %p1246_p10 = pnand %p1244_p9, %p1241_p8 }
  0x1d   :  { %1249 = shalt.err (!%p1246_p10)
}
  0x1e   :  { %s1250_s13 = scalar_lea.vmem %s1519_s12, 1024  ;;  %p1255_p12 = scmp.lt.s32.totalorder %s1519_s12, %s1519_s12 }
  0x1f   :  { %p1251_p11 = scmp.ne.s32.totalorder %s1519_s12, %s1250_s13  ;;  %p1256_p13 = scmp.lt.s32.totalorder %s1250_s13, %s1250_s13 }
  0x21   :  { %p1257_p0 = por %p1256_p13, %p1255_p12 }
  0x23   :  { %p1258_p1 = pnand %p1257_p0, %p1251_p11 }
  0x25   :  { %1261 = shalt.err (!%p1258_p1)
}
  0x26   :  { %s1456_s1 = smov 128   ;;  %s1457_s10 = smov 8  }
  0x27   :  { %69 = dma.hbm_to_vmem [thread:$0]  %s1696_s3, 1024, %s1519_s12, [#allocation9], %s1456_s1, %s1456_s1, %s1457_s10  }
  0x28   :  { %s1458_s16 = smov [#allocation11]   ;;  %s1459_s18 = smov [#allocation2]  }
  0x29   :  { %s87_s17 = sshll.u32 %s1458_s16, 4  ;;  %s27_s19 = sshll.u32 %s1459_s18, 4  ;;  %s88_s17 = int_to_ptr.vmem [resolvable:$true] %s87_s17  ;;  %s1553_s19 = int_to_ptr.vmem [resolvable:$true] %s27_s19 }
  0x2a   :  { %s1262_s24 = scalar_lea.hbm %s1698_s5, 2048 }
  0x2b   :  { %p1263_p2 = scmp.ne.s32.totalorder %s1698_s5, %s1262_s24  ;;  %p1266_p3 = scmp.lt.u32.totalorder %s1262_s24, %s1698_s5 }
  0x2d   :  { %p1268_p4 = pnand %p1266_p3, %p1263_p2 }
  0x2f   :  { %1271 = shalt.err (!%p1268_p4)
}
  0x30   :  { %s1272_s3 = scalar_lea.vmem %s88_s17, 2048  ;;  %p1277_p6 = scmp.lt.s32.totalorder %s88_s17, %s88_s17 }
  0x31   :  { %p1273_p5 = scmp.ne.s32.totalorder %s88_s17, %s1272_s3  ;;  %p1278_p7 = scmp.lt.s32.totalorder %s1272_s3, %s1272_s3 }
  0x33   :  { %p1279_p8 = por %p1278_p7, %p1277_p6 }
  0x35   :  { %p1280_p9 = pnand %p1279_p8, %p1273_p5 }
  0x37   :  { %1283 = shalt.err (!%p1280_p9)
}
  0x38   :  { %93 = dma.hbm_to_vmem [thread:$0]  %s1698_s5, 2048, %s88_s17, [#allocation12], %s1456_s1, %s1456_s1, %s1457_s10  }
  0x39   :  { %s1284_s13 = scalar_lea.hbm %s1693_s0, 1024 }
  0x3a   :  { %p1285_p10 = scmp.ne.s32.totalorder %s1693_s0, %s1284_s13  ;;  %p1288_p11 = scmp.lt.u32.totalorder %s1284_s13, %s1693_s0 }
  0x3c   :  { %p1290_p12 = pnand %p1288_p11, %p1285_p10 }
  0x3e   :  { %1293 = shalt.err (!%p1290_p12)
}
  0x3f   :  { %s1294_s20 = scalar_lea.vmem %s1553_s19, 1024  ;;  %p1299_p0 = scmp.lt.s32.totalorder %s1553_s19, %s1553_s19 }
  0x40   :  { %p1295_p13 = scmp.ne.s32.totalorder %s1553_s19, %s1294_s20  ;;  %p1300_p1 = scmp.lt.s32.totalorder %s1294_s20, %s1294_s20 }
  0x42   :  { %p1301_p2 = por %p1300_p1, %p1299_p0 }
  0x44   :  { %p1302_p3 = pnand %p1301_p2, %p1295_p13 }
  0x46   :  { %1305 = shalt.err (!%p1302_p3)
}
  0x47   :  { %33 = dma.hbm_to_vmem [thread:$0]  %s1693_s0, 1024, %s1553_s19, [#allocation3], %s1454_s21, %s1454_s21, %s1455_s22  }
  0x48   :  { %s1460_s10 = smov [#allocation7]   ;;  %s1461_s23 = smov [#allocation10]  }
  0x49   :  { %s51_s17 = sshll.u32 %s1460_s10, 4  ;;  %s75_s24 = sshll.u32 %s1461_s23, 4  ;;  %s52_s17 = int_to_ptr.vmem [resolvable:$true] %s51_s17  ;;  %s1587_s24 = int_to_ptr.vmem [resolvable:$true] %s75_s24 }
  0x4a   :  { %s1306_s27 = scalar_lea.hbm %s1695_s2, 512 }
  0x4b   :  { %p1307_p4 = scmp.ne.s32.totalorder %s1695_s2, %s1306_s27  ;;  %p1310_p5 = scmp.lt.u32.totalorder %s1306_s27, %s1695_s2 }
  0x4d   :  { %p1312_p6 = pnand %p1310_p5, %p1307_p4 }
  0x4f   :  { %1315 = shalt.err (!%p1312_p6)
}
  0x50   :  { %s1316_s0 = scalar_lea.vmem %s52_s17, 512  ;;  %p1321_p8 = scmp.lt.s32.totalorder %s52_s17, %s52_s17 }
  0x51   :  { %p1317_p7 = scmp.ne.s32.totalorder %s52_s17, %s1316_s0  ;;  %p1322_p9 = scmp.lt.s32.totalorder %s1316_s0, %s1316_s0 }
  0x53   :  { %p1323_p10 = por %p1322_p9, %p1321_p8 }
  0x55   :  { %p1324_p11 = pnand %p1323_p10, %p1317_p7 }
  0x57   :  { %1327 = shalt.err (!%p1324_p11)
}
  0x58   :  { %57 = dma.hbm_to_vmem [thread:$0]  %s1695_s2, 512, %s52_s17, [#allocation6], %s1454_s21, %s1454_s21, %s1455_s22  }
  0x59   :  { %s1328_s14 = scalar_lea.hbm %s1697_s4, 1024 }
  0x5a   :  { %p1329_p12 = scmp.ne.s32.totalorder %s1697_s4, %s1328_s14  ;;  %p1332_p13 = scmp.lt.u32.totalorder %s1328_s14, %s1697_s4 }
  0x5c   :  { %p1334_p0 = pnand %p1332_p13, %p1329_p12 }
  0x5e   :  { %1337 = shalt.err (!%p1334_p0)
}
  0x5f   :  { %s1338_s5 = scalar_lea.vmem %s1587_s24, 1024  ;;  %p1343_p2 = scmp.lt.s32.totalorder %s1587_s24, %s1587_s24 }
  0x60   :  { %p1339_p1 = scmp.ne.s32.totalorder %s1587_s24, %s1338_s5  ;;  %p1344_p3 = scmp.lt.s32.totalorder %s1338_s5, %s1338_s5 }
  0x62   :  { %p1345_p4 = por %p1344_p3, %p1343_p2 }
  0x64   :  { %p1346_p5 = pnand %p1345_p4, %p1339_p1 }
  0x66   :  { %1349 = shalt.err (!%p1346_p5)
}
  0x67   :  { %81 = dma.hbm_to_vmem [thread:$0]  %s1697_s4, 1024, %s1587_s24, [#allocation9], %s1454_s21, %s1454_s21, %s1455_s22  }
  0x68   :  { %s1462_s10 = smov [#allocation13]   ;;  %s1463_s23 = smov [#allocation14]  }
  0x69   :  { %s99_s17 = sshll.u32 %s1462_s10, 4  ;;  %s112_s25 = sshll.u32 %s1463_s23, 4  ;;  %s100_s17 = int_to_ptr.vmem [resolvable:$true] %s99_s17  ;;  %s113_s25 = int_to_ptr.vmem [resolvable:$true] %s112_s25 }
  0x6a   :  { %s1350_s28 = scalar_lea.hbm %s1699_s6, 512 }
  0x6b   :  { %p1351_p6 = scmp.ne.s32.totalorder %s1699_s6, %s1350_s28  ;;  %p1354_p7 = scmp.lt.u32.totalorder %s1350_s28, %s1699_s6 }
  0x6d   :  { %p1356_p8 = pnand %p1354_p7, %p1351_p6 }
  0x6f   :  { %1359 = shalt.err (!%p1356_p8)
}
  0x70   :  { %s1360_s4 = scalar_lea.vmem %s100_s17, 512  ;;  %p1365_p10 = scmp.lt.s32.totalorder %s100_s17, %s100_s17 }
  0x71   :  { %p1361_p9 = scmp.ne.s32.totalorder %s100_s17, %s1360_s4  ;;  %p1366_p11 = scmp.lt.s32.totalorder %s1360_s4, %s1360_s4 }
  0x73   :  { %p1367_p12 = por %p1366_p11, %p1365_p10 }
  0x75   :  { %p1368_p13 = pnand %p1367_p12, %p1361_p9 }
  0x77   :  { %1371 = shalt.err (!%p1368_p13)
}
  0x78   :  { %105 = dma.hbm_to_vmem [thread:$0]  %s1699_s6, 512, %s100_s17, [#allocation12], %s1454_s21, %s1454_s21, %s1455_s22  }
  0x79   :  { %s1372_s13 = scalar_lea.hbm %s1700_s7, 16 }
  0x7a   :  { %p1373_p0 = scmp.ne.s32.totalorder %s1700_s7, %s1372_s13  ;;  %p1376_p1 = scmp.lt.u32.totalorder %s1372_s13, %s1700_s7 }
  0x7c   :  { %p1378_p2 = pnand %p1376_p1, %p1373_p0 }
  0x7e   :  { %1381 = shalt.err (!%p1378_p2)
}
  0x7f   :  { %s1382_s20 = scalar_lea.vmem %s113_s25, 16  ;;  %s1386_s5 = scalar_lea.vmem %s113_s25, 32 }
  0x80   :  { %p1383_p3 = scmp.ne.s32.totalorder %s113_s25, %s1382_s20  ;;  %p1387_p4 = scmp.lt.s32.totalorder %s113_s25, %s113_s25 }
  0x81   :  { %p1388_p5 = scmp.lt.s32.totalorder %s1386_s5, %s1382_s20 }
  0x83   :  { %p1389_p6 = por %p1388_p5, %p1387_p4 }
  0x85   :  { %p1390_p7 = pnand %p1389_p6, %p1383_p3 }
  0x87   :  { %1393 = shalt.err (!%p1390_p7)
}
  0x88   :  { %115 = dma.hbm_to_vmem [thread:$0]  %s1700_s7, 16, %s113_s25, [#allocation15]  }
  0x89   :  { %1438 = dma.done.wait [#allocation3], 1024  }
  0x8a   :  { %1439 = vsyncadd [#allocation3], 4294966272 }
  0x8b   :  { %1440 = dma.done.wait [#allocation6], 1536  }
  0x8c   :  { %1441 = vsyncadd [#allocation6], 4294965760 }
  0x8d   :  { %1442 = dma.done.wait [#allocation9], 2048  }
  0x8e   :  { %1443 = vsyncadd [#allocation9], 4294965248 }
  0x8f   :  { %1444 = dma.done.wait [#allocation12], 2560  }
  0x90   :  { %1445 = vsyncadd [#allocation12], 4294964736 }
  0x91   :  { %1446 = dma.done.wait [#allocation15], 16  }
  0x92   :  { %1447 = vsyncadd [#allocation15], 4294967280  ;;  %v1464_v0 = vmov 0   ;;  %v1182_v1 = vld [vmem:[#allocation2] sm:$0xff]   ;;  %v1183_v2 = vld [vmem:[#allocation2 + $0x8] sm:$0xff]   ;;  %vm530_vm0 = vcmask 523264  }
  0x93   :  { %1180 = vset.pattern.permute.xlu0 %v1464_v0  ;;  %1181 = vset.pattern.permute.xlu1 %v1464_v0  ;;  %v1184_v3 = vld [vmem:[#allocation2 + $0x10] sm:$0xff]   ;;  %v1185_v4 = vld [vmem:[#allocation2 + $0x18] sm:$0xff]   ;;  %v1190_v5 = vld [vmem:[#allocation7] sm:$0xff]   ;;  %vm1466_vm1 = vmmov 0   ;;  %s1467_s7 = smov [#allocation16]  }
  0x94   :  { %1067 = vmatprep.subr.bf16.mxu0 %v1182_v1  ;;  %1083 = vmatprep.mubr.bf16.mxu0 %v1190_v5  ;;  %v1186_v6 = vld [vmem:[#allocation2 + $0x20] sm:$0xff]   ;;  %v183_v8 = vld [vmem:[#allocation8 + $0x10] sm:$0xff]  ;;  %v182_v9 = vld [vmem:[#allocation8 + $0x8] sm:$0xff]  ;;  %s950_s22 = sshll.u32 %s1467_s7, 4  ;;  %s951_s22 = int_to_ptr.vmem [resolvable:$true] %s950_s22 }
  0x95   :  { %1068 = vmatpush3.bf16.msra.mxu0 %v1182_v1  ;;  %v181_v7 = vld [vmem:[#allocation8] sm:$0xff]  ;;  %201 = vperm.xlu1 %1181, %v183_v8   ;;  %v184_v10 = vld [vmem:[#allocation8 + $0x18] sm:$0xff]  ;;  %v1187_v11 = vld [vmem:[#allocation2 + $0x28] sm:$0xff]   ;;  %s1394_s2 = scalar_lea.vmem %s951_s22, 128  ;;  %p1399_p9 = scmp.lt.s32.totalorder %s951_s22, %s951_s22 }
  0x96   :  { %1069 = vmatprep.subr.bf16.mxu0 %v1183_v2  ;;  %191 = vperm.xlu0 %1180, %v181_v7   ;;  %v185_v12 = vld [vmem:[#allocation8 + $0x20] sm:$0xff]  ;;  %v186_v13 = vld [vmem:[#allocation8 + $0x28] sm:$0xff]  ;;  %v1188_v14 = vld [vmem:[#allocation2 + $0x30] sm:$0xff]   ;;  %p1395_p8 = scmp.ne.s32.totalorder %s951_s22, %s1394_s2  ;;  %p1400_p10 = scmp.lt.s32.totalorder %s1394_s2, %s1394_s2 }
  0x97   :  { %v187_v15 = vld [vmem:[#allocation8 + $0x30] sm:$0xff]  ;;  %v188_v16 = vld [vmem:[#allocation8 + $0x38] sm:$0xff]  ;;  %v394_v18 = vld [vmem:[#allocation11] sm:$0xff] }
  0x98   :  { %v1189_v17 = vld [vmem:[#allocation2 + $0x38] sm:$0xff]   ;;  %v395_v19 = vld [vmem:[#allocation11 + $0x8] sm:$0xff]  ;;  %v396_v21 = vld [vmem:[#allocation11 + $0x10] sm:$0xff]  ;;  %p1401_p11 = por %p1400_p10, %p1399_p9 }
  0x99   :  { %1070 = vmatpush3.bf16.msra.mxu0 %v1183_v2  ;;  %206 = vperm.xlu1 %1181, %v184_v10   ;;  %v1191_v20 = vld [vmem:[#allocation7 + $0x8] sm:$0xff]   ;;  %v397_v22 = vld [vmem:[#allocation11 + $0x18] sm:$0xff]  ;;  %v1192_v23 = vld [vmem:[#allocation7 + $0x10] sm:$0xff]  }
  0x9a   :  { %1071 = vmatprep.subr.bf16.mxu0 %v1184_v3  ;;  %196 = vperm.xlu0 %1180, %v182_v9   ;;  %v398_v24 = vld [vmem:[#allocation11 + $0x20] sm:$0xff]  ;;  %v399_v25 = vld [vmem:[#allocation11 + $0x28] sm:$0xff]  ;;  %v1193_v26 = vld [vmem:[#allocation7 + $0x18] sm:$0xff]   ;;  %p1402_p12 = pnand %p1401_p11, %p1395_p8 }
  0x9b   :  { %v400_v27 = vld [vmem:[#allocation11 + $0x30] sm:$0xff]  ;;  %v401_v28 = vld [vmem:[#allocation11 + $0x38] sm:$0xff]  ;;  %v402_v29 = vld [vmem:[#allocation11 + $0x40] sm:$0xff] }
  0x9c   :  { %v403_v30 = vld [vmem:[#allocation11 + $0x48] sm:$0xff]  ;;  %v404_v31 = vld [vmem:[#allocation11 + $0x50] sm:$0xff]  ;;  %v405_v32 = vld [vmem:[#allocation11 + $0x58] sm:$0xff] }
  0x9d   :  { %1072 = vmatpush3.bf16.msra.mxu0 %v1184_v3  ;;  %216 = vperm.xlu1 %1181, %v186_v13   ;;  %v406_v33 = vld [vmem:[#allocation11 + $0x60] sm:$0xff]  ;;  %v407_v34 = vld [vmem:[#allocation11 + $0x68] sm:$0xff]  ;;  %v408_v35 = vld [vmem:[#allocation11 + $0x70] sm:$0xff] }
  0x9e   :  { %1073 = vmatprep.subr.bf16.mxu0 %v1185_v4  ;;  %211 = vperm.xlu0 %1180, %v185_v12   ;;  %v409_v36 = vld [vmem:[#allocation11 + $0x78] sm:$0xff]  ;;  %v1194_v37 = vld [vmem:[#allocation10] sm:$0xff]   ;;  %v1196_v12 = vld [vmem:[#allocation10 + $0x10] sm:$0xff]  }
  0x9f   :  { %1099 = vmatprep.mubr.msk.bf16.mxu1 %vm530_vm0, %v1194_v37  ;;  %v1202_v10 = vld [vmem:[#allocation5] sm:$0xff]   ;;  %v1203_v13 = vld [vmem:[#allocation5 + $0x8] sm:$0xff]  }
  0xa1   :  { %1074 = vmatpush3.bf16.msra.mxu0 %v1185_v4  ;;  %226 = vperm.xlu1 %1181, %v188_v16   ;;  %v1198_v16 = vld [vmem:[#allocation10 + $0x20] sm:$0xff]  }
  0xa2   :  { %1075 = vmatprep.subr.bf16.mxu0 %v1186_v6  ;;  %221 = vperm.xlu0 %1180, %v187_v15   ;;  %v1197_v15 = vld [vmem:[#allocation10 + $0x18] sm:$0xff]  }
  0xa5   :  { %1076 = vmatpush3.bf16.msra.mxu0 %v1186_v6  ;;  %417 = vperm.xlu1 %1181, %v395_v19   ;;  %v1199_v19 = vld [vmem:[#allocation10 + $0x28] sm:$0xff]  }
  0xa6   :  { %1077 = vmatprep.subr.bf16.mxu0 %v1187_v11  ;;  %412 = vperm.xlu0 %1180, %v394_v18   ;;  %v1206_v18 = vld [vmem:[#allocation5 + $0x20] sm:$0xff]  }
  0xa9   :  { %1078 = vmatpush3.bf16.msra.mxu0 %v1187_v11  ;;  %427 = vperm.xlu1 %1181, %v397_v22   ;;  %v1195_v11 = vld [vmem:[#allocation10 + $0x8] sm:$0xff]   ;;  %v1201_v22 = vld [vmem:[#allocation10 + $0x38] sm:$0xff]  }
  0xaa   :  { %1079 = vmatprep.subr.bf16.mxu0 %v1188_v14  ;;  %422 = vperm.xlu0 %1180, %v396_v21   ;;  %v1207_v21 = vld [vmem:[#allocation5 + $0x28] sm:$0xff]  }
  0xad   :  { %1080 = vmatpush3.bf16.msra.mxu0 %v1188_v14  ;;  %437 = vperm.xlu1 %1181, %v399_v25   ;;  %v1204_v14 = vld [vmem:[#allocation5 + $0x10] sm:$0xff]  }
  0xae   :  { %1081 = vmatprep.subr.bf16.mxu0 %v1189_v17  ;;  %432 = vperm.xlu0 %1180, %v398_v24   ;;  %v1209_v24 = vld [vmem:[#allocation5 + $0x38] sm:$0xff]  }
  0xb1   :  { %1082 = vmatpush3.bf16.msra.mxu0 %v1189_v17  ;;  %447 = vperm.xlu1 %1181, %v401_v28   ;;  %v1205_v17 = vld [vmem:[#allocation5 + $0x18] sm:$0xff]  }
  0xb2   :  { %442 = vperm.xlu0 %1180, %v400_v27  }
  0xb4   :  { %1084 = vmatmul.mubr.bf16.vlgmr.msra.gmra.mrb[0].mxu0 %v1191_v20  ;;  %v1200_v20 = vld [vmem:[#allocation10 + $0x30] sm:$0xff]  }
  0xb5   :  { %1087 = vmatprep.mubr.bf16.mxu0 %v1192_v23  ;;  %457 = vperm.xlu1 %1181, %v403_v30   ;;  %v1208_v23 = vld [vmem:[#allocation5 + $0x30] sm:$0xff]  }
  0xb6   :  { %452 = vperm.xlu0 %1180, %v402_v29  }
  0xb9   :  { %467 = vperm.xlu1 %1181, %v405_v32  }
  0xba   :  { %462 = vperm.xlu0 %1180, %v404_v31  }
  0xbc   :  { %1088 = vmatmul.mubr.bf16.gmra.mrb[4].mxu0 %v1193_v26 }
  0xbd   :  { %477 = vperm.xlu1 %1181, %v407_v34  }
  0xbe   :  { %472 = vperm.xlu0 %1180, %v406_v33  }
  0xc1   :  { %487 = vperm.xlu1 %1181, %v409_v36  }
  0xc2   :  { %482 = vperm.xlu0 %1180, %v408_v35  }
 0x114   :  { %v202_v39 = vpop.permute.xlu1 %201 }
 0x115   :  { %v192_v38 = vpop.permute.xlu0 %191 }
 0x118   :  { %v207_v41 = vpop.permute.xlu1 %206 }
 0x119   :  { %v197_v40 = vpop.permute.xlu0 %196 }
 0x11c   :  { %v217_v50 = vpop.permute.xlu1 %216 }
 0x11d   :  { %v212_v45 = vpop.permute.xlu0 %211 }
 0x120   :  { %v227_v62 = vpop.permute.xlu1 %226 }
 0x121   :  { %v222_v57 = vpop.permute.xlu0 %221 }
 0x124   :  { %v418_v26 = vpop.permute.xlu1 %417 }
 0x125   :  { %v413_v25 = vpop.permute.xlu0 %412 }
 0x128   :  { %v428_v28 = vpop.permute.xlu1 %427 }
 0x129   :  { %v423_v27 = vpop.permute.xlu0 %422 }
 0x12c   :  { %v438_v30 = vpop.permute.xlu1 %437 }
 0x12d   :  { %v433_v29 = vpop.permute.xlu0 %432 }
 0x130   :  { %v448_v34 = vpop.permute.xlu1 %447 }
 0x131   :  { %v443_v32 = vpop.permute.xlu0 %442 }
 0x187   :  { %v1085_v42 = vpop.f32.mrb[0].mxu0 }
 0x188   :  { %v344_v43 = vadd.f32 %v1085_v42, %v202_v39  ;;  %v335_v44 = vpop.f32.mrb[1].mxu0 }
 0x189   :  { %v336_v46 = vadd.f32 %v335_v44, %v192_v38  ;;  %v1086_v47 = vpop.f32.mrb[2].mxu0  ;;  %v458_v44 = vpop.permute.xlu1 %457 }
 0x18a   :  { %v347_v48 = vadd.f32 %v1086_v47, %v207_v41  ;;  %v338_v49 = vpop.f32.mrb[3].mxu0  ;;  %v368_v52 = vmax.f32 %v344_v43, 0.0  ;;  %v453_v43 = vpop.permute.xlu0 %452 }
 0x18b   :  { %v339_v51 = vadd.f32 %v338_v49, %v197_v40  ;;  %v366_v54 = vmax.f32 %v336_v46, 0.0 }
 0x18c   :  { %v369_v53 = vmax.f32 %v347_v48, 0.0 }
 0x18d   :  { %v367_v55 = vmax.f32 %v339_v51, 0.0 }
 0x18e   :  { %v375_v56 = vpack.c.bf16 %v369_v53, %v368_v52  ;;  %v463_v53 = vpop.permute.xlu0 %462 }
 0x18f   :  { %v1089_v58 = vpop.f32.mrb[4].mxu0  ;;  %v374_v59 = vpack.c.bf16 %v367_v55, %v366_v54  ;;  %v468_v55 = vpop.permute.xlu1 %467 }
 0x190   :  { %v360_v60 = vadd.f32 %v1089_v58, %v222_v57  ;;  %v351_v61 = vpop.f32.mrb[5].mxu0 }
 0x191   :  { %v352_v63 = vadd.f32 %v351_v61, %v212_v45  ;;  %v1090_v0 = vpop.f32.mrb[6].mxu0  ;;  %1091 = vmatprep.subr.bf16.mxu1 %v374_v59 }
 0x192   :  { %v363_v1 = vadd.f32 %v1090_v0, %v227_v62  ;;  %v354_v2 = vpop.f32.mrb[7].mxu0  ;;  %1092 = vmatpush3.bf16.msra.mxu1 %v374_v59  ;;  %v372_v4 = vmax.f32 %v360_v60, 0.0  ;;  %v473_v60 = vpop.permute.xlu0 %472 }
 0x193   :  { %v355_v3 = vadd.f32 %v354_v2, %v217_v50  ;;  %1093 = vmatprep.subr.bf16.mxu1 %v375_v56  ;;  %v370_v6 = vmax.f32 %v352_v63, 0.0  ;;  %v478_v0 = vpop.permute.xlu1 %477 }
 0x194   :  { %v373_v5 = vmax.f32 %v363_v1, 0.0 }
 0x195   :  { %v371_v7 = vmax.f32 %v355_v3, 0.0 }
 0x196   :  { %v377_v8 = vpack.c.bf16 %v373_v5, %v372_v4  ;;  %1094 = vmatpush3.bf16.msra.mxu1 %v375_v56 }
 0x197   :  { %v376_v9 = vpack.c.bf16 %v371_v7, %v370_v6  ;;  %v483_v6 = vpop.permute.xlu0 %482 }
 0x199   :  { %1095 = vmatprep.subr.bf16.mxu1 %v376_v9 }
 0x19a   :  { %1096 = vmatpush3.bf16.msra.mxu1 %v376_v9 }
 0x19b   :  { %1097 = vmatprep.subr.bf16.mxu1 %v377_v8 }
 0x19e   :  { %1098 = vmatpush3.bf16.msra.mxu1 %v377_v8  ;;  %v488_v8 = vpop.permute.xlu1 %487 }
 0x19f   :  { %1115 = vmatprep.subr.bf16.mxu1 %v1202_v10 }
 0x1a1   :  { %1100 = vmatmul.mubr.msk.bf16.vlgmr.msra.gmra.mrb[0].mxu1 %vm530_vm0, %v1195_v11 }
 0x1a2   :  { %1103 = vmatprep.mubr.msk.bf16.mxu1 %vm530_vm0, %v1196_v12  ;;  %1116 = vmatpush3.bf16.msra.mxu1 %v1202_v10 }
 0x1a3   :  { %1117 = vmatprep.subr.bf16.mxu1 %v1203_v13 }
 0x1a6   :  { %1118 = vmatpush3.bf16.msra.mxu1 %v1203_v13 }
 0x1a7   :  { %1119 = vmatprep.subr.bf16.mxu1 %v1204_v14 }
 0x1a9   :  { %1104 = vmatmul.mubr.msk.bf16.gmra.mrb[4].mxu1 %vm530_vm0, %v1197_v15 }
 0x1aa   :  { %1107 = vmatprep.mubr.msk.bf16.mxu1 %vm530_vm0, %v1198_v16  ;;  %1120 = vmatpush3.bf16.msra.mxu1 %v1204_v14 }
 0x1ab   :  { %1121 = vmatprep.subr.bf16.mxu1 %v1205_v17 }
 0x1ae   :  { %1122 = vmatpush3.bf16.msra.mxu1 %v1205_v17  ;;  %v1210_v17 = vld [vmem:[#allocation13] sm:$0xff]  }
 0x1af   :  { %1123 = vmatprep.subr.bf16.mxu1 %v1206_v18 }
 0x1b1   :  { %1108 = vmatmul.mubr.msk.bf16.gmra.mrb[8].mxu1 %vm530_vm0, %v1199_v19  ;;  %v1211_v19 = vld [vmem:[#allocation13 + $0x8] sm:$0xff]  }
 0x1b2   :  { %1111 = vmatprep.mubr.msk.bf16.mxu1 %vm530_vm0, %v1200_v20  ;;  %1124 = vmatpush3.bf16.msra.mxu1 %v1206_v18  ;;  %v1465_v18 = vmov 0.0   ;;  %v1212_v20 = vld [vmem:[#allocation13 + $0x10] sm:$0xff]  }
 0x1b3   :  { %1125 = vmatprep.subr.bf16.mxu1 %v1207_v21  ;;  %1139 = vmatprep.subr.bf16.mxu0 %v1465_v18 }
 0x1b4   :  { %1140 = vmatpush3.bf16.msra.mxu0 %v1210_v17  ;;  %1147 = vmatprep.mubr.msk.bf16.mxu0 %vm1466_vm1, %v1465_v18 }
 0x1b5   :  { %1141 = vmatprep.subr.bf16.mxu0 %v1465_v18 }
 0x1b6   :  { %1126 = vmatpush3.bf16.msra.mxu1 %v1207_v21  ;;  %v1213_v21 = vld [vmem:[#allocation13 + $0x18] sm:$0xff]  }
 0x1b7   :  { %1127 = vmatprep.subr.bf16.mxu1 %v1208_v23 }
 0x1b8   :  { %1142 = vmatpush3.bf16.msra.mxu0 %v1211_v19 }
 0x1b9   :  { %1112 = vmatmul.mubr.msk.bf16.gmra.mrb[12].mxu1 %vm530_vm0, %v1201_v22  ;;  %1143 = vmatprep.subr.bf16.mxu0 %v1465_v18 }
 0x1ba   :  { %1128 = vmatpush3.bf16.msra.mxu1 %v1208_v23 }
 0x1bb   :  { %1129 = vmatprep.subr.bf16.mxu1 %v1209_v24 }
 0x1bc   :  { %1144 = vmatpush3.bf16.msra.mxu0 %v1212_v20 }
 0x1bd   :  { %1145 = vmatprep.subr.bf16.mxu0 %v1465_v18 }
 0x1be   :  { %1130 = vmatpush3.bf16.msra.mxu1 %v1209_v24 }
 0x1c0   :  { %1146 = vmatpush3.bf16.msra.mxu0 %v1213_v21 }
 0x1c1   :  { %1151 = vmatprep.subr.bf16.mxu0 %v1465_v18 }
 0x274   :  { %v1101_v31 = vpop.f32.mrb[0].mxu1 }
 0x275   :  { %v589_v33 = vpop.f32.mrb[1].mxu1  ;;  %v598_v36 = vadd.f32 %v1101_v31, %v423_v27 }
 0x276   :  { %v1102_v35 = vpop.f32.mrb[2].mxu1  ;;  %v590_v39 = vadd.f32 %v589_v33, %v413_v25 }
 0x277   :  { %v601_v37 = vadd.f32 %v1102_v35, %v428_v28  ;;  %v592_v38 = vpop.f32.mrb[3].mxu1 }
 0x278   :  { %v593_v40 = vadd.f32 %v592_v38, %v418_v26 }
 0x279   :  { %v653_v41 = vpack.c.bf16 %v601_v37, %v598_v36 }
 0x27a   :  { %v652_v42 = vpack.c.bf16 %v593_v40, %v590_v39  ;;  %v1013_v40 = vld [vmem:[#allocation14] ss:$0 sm:$0xff] }
 0x27c   :  { %v1105_v45 = vpop.f32.mrb[4].mxu1  ;;  %1131 = vmatprep.mubr.bf16.mxu1 %v652_v42 }
 0x27d   :  { %v605_v46 = vpop.f32.mrb[5].mxu1  ;;  %1132 = vmatmul.mubr.bf16.vlgmr.msra.gmra.mrb[16].mxu1 %v653_v41  ;;  %v614_v48 = vadd.f32 %v1105_v45, %v443_v32 }
 0x27e   :  { %v1106_v47 = vpop.f32.mrb[6].mxu1  ;;  %v606_v51 = vadd.f32 %v605_v46, %v433_v29 }
 0x27f   :  { %v617_v49 = vadd.f32 %v1106_v47, %v448_v34  ;;  %v608_v50 = vpop.f32.mrb[7].mxu1 }
 0x280   :  { %v609_v52 = vadd.f32 %v608_v50, %v438_v30 }
 0x281   :  { %v655_v54 = vpack.c.bf16 %v617_v49, %v614_v48 }
 0x282   :  { %v654_v56 = vpack.c.bf16 %v609_v52, %v606_v51 }
 0x284   :  { %v1109_v57 = vpop.f32.mrb[8].mxu1  ;;  %1135 = vmatprep.mubr.bf16.mxu1 %v654_v56 }
 0x285   :  { %v621_v58 = vpop.f32.mrb[9].mxu1  ;;  %1136 = vmatmul.mubr.bf16.gmra.mrb[20].mxu1 %v655_v54  ;;  %v1659_v61 = vadd.f32 %v1109_v57, %v463_v53 }
 0x286   :  { %v1110_v59 = vpop.f32.mrb[10].mxu1  ;;  %v622_v1 = vadd.f32 %v621_v58, %v453_v43 }
 0x287   :  { %v1661_v62 = vadd.f32 %v1110_v59, %v468_v55  ;;  %v624_v63 = vpop.f32.mrb[11].mxu1 }
 0x288   :  { %v625_v2 = vadd.f32 %v624_v63, %v458_v44 }
 0x289   :  { %v657_v3 = vpack.c.bf16 %v1661_v62, %v1659_v61 }
 0x28a   :  { %v656_v4 = vpack.c.bf16 %v625_v2, %v622_v1 }
 0x28c   :  { %v1113_v5 = vpop.f32.mrb[12].mxu1 }
 0x28d   :  { %v637_v7 = vpop.f32.mrb[13].mxu1  ;;  %v646_v10 = vadd.f32 %v1113_v5, %v483_v6 }
 0x28e   :  { %v1114_v9 = vpop.f32.mrb[14].mxu1  ;;  %v638_v13 = vadd.f32 %v637_v7, %v473_v60 }
 0x28f   :  { %v649_v11 = vadd.f32 %v1114_v9, %v488_v8  ;;  %v640_v12 = vpop.f32.mrb[15].mxu1 }
 0x290   :  { %v641_v14 = vadd.f32 %v640_v12, %v478_v0 }
 0x291   :  { %v659_v15 = vpack.c.bf16 %v649_v11, %v646_v10 }
 0x292   :  { %v658_v16 = vpack.c.bf16 %v641_v14, %v638_v13 }
 0x350   :  { %v1133_v22 = vpop.f32.mrb[16].mxu1 }
 0x351   :  { %v742_v23 = vpop.f32.mrb[17].mxu1  ;;  %v775_v30 = vmax.f32 %v1133_v22, 0.0 }
 0x352   :  { %v773_v24 = vmax.f32 %v742_v23, 0.0  ;;  %v1134_v25 = vpop.f32.mrb[18].mxu1 }
 0x353   :  { %v745_v26 = vpop.f32.mrb[19].mxu1  ;;  %v776_v33 = vmax.f32 %v1134_v25, 0.0 }
 0x354   :  { %781 = vxpose.xlu0.b32.start [1/8] (short) (narrow) %v773_v24, 8  ;;  %v774_v27 = vmax.f32 %v745_v26, 0.0 }
 0x358   :  { %782 = vxpose.xlu0.b32.cont [2/8] (short) (narrow) %v774_v27, 8  ;;  %v1137_v28 = vpop.f32.mrb[20].mxu1 }
 0x359   :  { %v758_v29 = vpop.f32.mrb[21].mxu1  ;;  %v779_v36 = vmax.f32 %v1137_v28, 0.0 }
 0x35a   :  { %v1138_v31 = vpop.f32.mrb[22].mxu1  ;;  %v777_v34 = vmax.f32 %v758_v29, 0.0 }
 0x35b   :  { %v761_v32 = vpop.f32.mrb[23].mxu1  ;;  %v780_v37 = vmax.f32 %v1138_v31, 0.0 }
 0x35c   :  { %783 = vxpose.xlu0.b32.cont [3/8] (short) (narrow) %v775_v30, 8  ;;  %v778_v35 = vmax.f32 %v761_v32, 0.0 }
 0x360   :  { %784 = vxpose.xlu0.b32.cont [4/8] (short) (narrow) %v776_v33, 8 }
 0x364   :  { %785 = vxpose.xlu0.b32.cont [5/8] (short) (narrow) %v777_v34, 8 }
 0x368   :  { %786 = vxpose.xlu0.b32.cont [6/8] (short) (narrow) %v778_v35, 8 }
 0x36c   :  { %787 = vxpose.xlu0.b32.cont [7/8] (short) (narrow) %v779_v36, 8 }
 0x370   :  { %788 = vxpose.xlu0.b32.end [8/8] (short) (narrow) %v780_v37, 8 }
 0x3d4   :  { %v797_v38 = vpop.trf.xlu0 }
 0x3d5   :  { %v813_v39 = vpack.c.bf16 %v797_v38, %v797_v38 }
 0x3d7   :  { %1148 = vmatmul.mubr.msk.bf16.vlgmr.msra.gmra.mrb[8].mxu0 %vm530_vm0, %v813_v39 }
 0x3d8   :  { %1152 = vmatpush3.bf16.msra.mxu0 %v656_v4  ;;  %1159 = vmatprep.mubr.msk.bf16.mxu0 %vm1466_vm1, %v1465_v18 }
 0x3d9   :  { %1153 = vmatprep.subr.bf16.mxu0 %v1465_v18 }
 0x3dc   :  { %1154 = vmatpush3.bf16.msra.mxu0 %v657_v3 }
 0x3dd   :  { %1155 = vmatprep.subr.bf16.mxu0 %v1465_v18 }
 0x3e0   :  { %1156 = vmatpush3.bf16.msra.mxu0 %v658_v16 }
 0x3e1   :  { %1157 = vmatprep.subr.bf16.mxu0 %v1465_v18 }
 0x3e4   :  { %1158 = vmatpush3.bf16.msra.mxu0 %v659_v15 }
 0x3e7   :  { %1160 = vmatmul.mubr.msk.bf16.vlgmr.msra.gmra.mrb[12].mxu0 %vm530_vm0, %v813_v39 }
 0x4aa   :  { %v890_v41 = vpop.f32.mrb[8].mxu0 }
 0x4ab   :  { %v891_v42 = vadd.f32 %v1013_v40, %v890_v41  ;;  %v1149_v43 = vpop.f32.mrb[9].mxu0 }
 0x4ac   :  { %v893_v44 = vpop.f32.mrb[10].mxu0 }
 0x4ad   :  { %896 = vst [vmem:[#allocation16] sm:$0xff] %v891_v42  ;;  %v1150_v45 = vpop.f32.mrb[11].mxu0 }
 0x4ae   :  { %1405 = shalt.err (!%p1402_p12)
}
 0x4af   :  { %s1406_s17 = scalar_lea.hbm %s1701_s8, 128 }
 0x4b0   :  { %p1407_p13 = scmp.ne.s32.totalorder %s1701_s8, %s1406_s17  ;;  %p1410_p0 = scmp.lt.u32.totalorder %s1406_s17, %s1701_s8 }
 0x4b2   :  { %p1412_p1 = pnand %p1410_p0, %p1407_p13 }
 0x4b4   :  { %1415 = shalt.err (!%p1412_p1)
}
 0x4b5   :  { %953 = dma.vmem_to_hbm [thread:$0]  %s951_s22, 128, %s1701_s8, [#allocation4]  }
 0x4b6   :  { %s1468_s12 = smov [#allocation17]  }
 0x4b7   :  { %s960_s29 = sshll.u32 %s1468_s12, 4  ;;  %s961_s29 = int_to_ptr.vmem [resolvable:$true] %s960_s29 }
 0x4b8   :  { %s1416_s0 = scalar_lea.vmem %s961_s29, 128  ;;  %p1421_p3 = scmp.lt.s32.totalorder %s961_s29, %s961_s29 }
 0x4b9   :  { %p1417_p2 = scmp.ne.s32.totalorder %s961_s29, %s1416_s0  ;;  %p1422_p4 = scmp.lt.s32.totalorder %s1416_s0, %s1416_s0 }
 0x4ba   :  { %v931_v46 = vpop.f32.mrb[12].mxu0 }
 0x4bb   :  { %v1020_v47 = vmul.f32 -1.442695, %v931_v46  ;;  %v1161_v48 = vpop.f32.mrb[13].mxu0  ;;  %p1423_p5 = por %p1422_p4, %p1421_p3 }
 0x4bc   :  { %v934_v49 = vpop.f32.mrb[14].mxu0 }
 0x4bd   :  { %1214 = vpow2.f32 %v1020_v47  ;;  %v1162_v50 = vpop.f32.mrb[15].mxu0  ;;  %p1424_p6 = pnand %p1423_p5, %p1417_p2 }
 0x4c7   :  { %v1215_v51 = vpop.eup %1214 }
 0x4c8   :  { %v940_v52 = vadd.f32 1.0, %v1215_v51 }
 0x4ca   :  { %1216 = vrcp.f32 %v940_v52 }
 0x4d4   :  { %v1217_v53 = vpop.eup %1216 }
 0x4d5   :  { %943 = vst [vmem:[#allocation17] sm:$0xff] %v1217_v53 }
 0x4d6   :  { %1427 = shalt.err (!%p1424_p6)
}
 0x4d7   :  { %s1428_s24 = scalar_lea.hbm %s1702_s9, 128 }
 0x4d8   :  { %p1429_p7 = scmp.ne.s32.totalorder %s1702_s9, %s1428_s24  ;;  %p1432_p8 = scmp.lt.u32.totalorder %s1428_s24, %s1702_s9 }
 0x4da   :  { %p1434_p9 = pnand %p1432_p8, %p1429_p7 }
 0x4dc   :  { %1437 = shalt.err (!%p1434_p9)
}
 0x4dd   :  { %963 = dma.vmem_to_hbm [thread:$0]  %s961_s29, 128, %s1702_s9, [#allocation18]  }
 0x4de   :  { %1448 = dma.done.wait [#allocation4], 128  }
 0x4df   :  { %1449 = vsyncadd [#allocation4], 4294967168 }
 0x4e0   :  { %1450 = dma.done.wait [#allocation18], 128  }
 0x4e1   :  { %1451 = vsyncadd [#allocation18], 4294967168 }
 0x4e2   :  { %970 = vsyncpa [#allocation3], 1 }
 0x4e3   :  { %971 = vsyncpa [#allocation6], 1 }
 0x4e4   :  { %972 = vsyncpa [#allocation9], 1 }
 0x4e5   :  { %973 = vsyncpa [#allocation12], 1 }
 0x4e6   :  { %974 = vsyncpa [#allocation15], 1 }
 0x4e7   :  { %975 = vsyncpa [#allocation4], 1 }
 0x4e8   :  { %976 = vsyncpa [#allocation18], 1 }

</bundles_post_ra>
